<compile_context>
chip_gen: v7x
topology: tpu7x:2x2x1
jax: 0.10.0
libtpu: 0.0.40
codegen_flags: <defaults>
</compile_context>

<pallas_src>
import jax
import jax.numpy as jnp
from jax import lax
from jax.experimental import pallas as pl
from jax.experimental.pallas import tpu as pltpu


def _round_up(x, m):
    return ((x + m - 1) // m) * m


def _make_fused_kernel(layer_cfgs, *, batch, t_buf, w_row_offsets):
    """Fused multi-layer dilated-conv kernel body.

    layer_cfgs: tuple of (ksz, dilation, padding, cin, cout, lrelu, t_out).

    Activation layout: (C, batch * t_buf).  Each batch owns a t_buf-lane
    segment; valid data sits at lanes [0, t_valid) of its segment, the rest
    are zero.  Those zero lanes double as conv padding: dilated taps are
    circular lane rotations, and lanes that wrap into a neighbouring segment
    only ever pick up (a) that segment's zero tail (== left padding) or
    (b) data that lands outside the kept window and is masked away before the
    next layer / sliced away in the wrapper (geometry asserted in the wrapper).
    """
    n_layers = len(layer_cfgs)
    width = batch * t_buf

    def kernel(x_ref, w_ref, b_ref, o_ref):
        a = x_ref[...]                                   # (cin0, width)

        # Hoisted lane iota + per-t_out keep masks (float {0,1}), built once.
        lane = lax.broadcasted_iota(jnp.int32, (1, width), 1)
        masks = {}

        def keep_mask(t_out):
            m = None
            for b in range(batch):
                lo = b * t_buf
                mb = ((lane >= lo) & (lane < lo + t_out)).astype(jnp.float32)
                m = mb if m is None else m + mb          # segments disjoint
            return m

        for li, (ksz, dil, pad, cin, cout, lrelu, t_out) in enumerate(layer_cfgs):
            off = w_row_offsets[li]
            w = w_ref[off:off + cout, :]                 # (cout, kc_max)
            bias = b_ref[off:off + cout, :]              # (cout, 1)

            # Dilated taps as XLU lane rotations (jnp.roll convention):
            # tap_k[:, j] = a[:, j + k*dil - pad]  (wrapped lanes are zeros).
            taps = []
            for k in range(ksz):
                s = (pad - k * dil) % width
                taps.append(a if s == 0 else pltpu.roll(a, s, axis=1))

            if cin == 1:
                # Outer-product layer (Cin = 1): VPU broadcast MAC, MXU free.
                acc = w[:, 0:1] * taps[0]
                for k in range(1, ksz):
                    acc = acc + w[:, k:k + 1] * taps[k]
            else:
                # im2col: ONE lane-dense (cout, K*cin) x (K*cin, width) matmul.
                s_op = jnp.concatenate(taps, axis=0)     # (ksz*cin, width)
                acc = jnp.dot(w[:, :ksz * cin], s_op,
                              preferred_element_type=jnp.float32)

            acc = acc + bias                             # lane broadcast
            if lrelu:
                acc = jnp.maximum(acc, 0.2 * acc)        # LeakyReLU(0.2)
            # Dropout: identity (eval mode).

            if li < n_layers - 1:
                # Re-zero lanes outside the valid window: they are the next
                # layer's conv padding (and kill cross-segment leakage).
                if t_out not in masks:
                    masks[t_out] = keep_mask(t_out)
                a = acc * masks[t_out]
            else:
                # Full-width lane-dense store; wrapper slices the valid lanes.
                o_ref[...] = acc.astype(o_ref.dtype)

    return kernel


def _layer_dict(w_torch, bias, dilation, padding, ksz, cin, cout, lrelu):
    # im2col kernel layout (cout, K*cin), row order k*cin + ci.
    w_kernel = jnp.transpose(w_torch, (0, 2, 1)).reshape(cout, ksz * cin)
    return dict(w_torch=w_torch, w_kernel=w_kernel, b=bias,
                dilation=dilation, padding=padding,
                ksz=ksz, cin=cin, cout=cout, lrelu=lrelu)


def make_discriminator_params(key, in_channels, out_channels, inner_channels,
                              n_layers, kernel_size):
    """Deterministic synthetic parameters; matches the PyTorch __init__."""
    layers = []
    padding = 0
    for i in range(n_layers - 1):
        dilation = 1 if i == 0 else i
        cin = in_channels if i == 0 else inner_channels
        padding = (kernel_size - 1) // 2 * dilation
        key, kw, kb = jax.random.split(key, 3)
        w = jax.random.normal(kw, (inner_channels, cin, kernel_size),
                              jnp.float32) * 0.1
        bias = jax.random.normal(kb, (inner_channels,), jnp.float32) * 0.1
        layers.append(_layer_dict(w, bias, dilation, padding, kernel_size,
                                  cin, inner_channels, True))
    # Final conv: dilation 1, padding deliberately reused from the LAST loop
    # iteration (this is the PyTorch module's quirk — do not "fix" it).
    key, kw, kb = jax.random.split(key, 3)
    w = jax.random.normal(kw, (out_channels, inner_channels, kernel_size),
                          jnp.float32) * 0.1
    bias = jax.random.normal(kb, (out_channels,), jnp.float32) * 0.1
    layers.append(_layer_dict(w, bias, 1, padding, kernel_size,
                              inner_channels, out_channels, False))
    return layers


def discriminator_forward(x_ncw, layers):
    """x_ncw: (B, C_in, T) as in PyTorch.  Returns (B, C_out, T_out)."""
    B, cin0, T = x_ncw.shape

    # ---- static geometry (batch-in-lanes, data at lane 0 of each segment) ---
    cfgs, t_cur, needed = [], T, 0
    for l in layers:
        ksz, dil, pad = l["ksz"], l["dilation"], l["padding"]
        t_out = t_cur + 2 * pad - dil * (ksz - 1)
        pos_shift = max(0, pad)                       # data moves right by pad
        neg_shift = max(0, dil * (ksz - 1) - pad)     # data moves left
        needed = max(needed, t_cur + pos_shift, t_out + neg_shift)
        cfgs.append((ksz, dil, pad, l["cin"], l["cout"], l["lrelu"], t_out))
        t_cur = t_out
    t_out_final = t_cur
    t_buf = _round_up(max(needed, 128), 128)
    # Invariant of the circular-roll padding scheme: every segment keeps at
    # least `max shift` zero tail lanes beyond its valid window.
    assert needed <= t_buf, (needed, t_buf)
    width = B * t_buf
    cout_f = layers[-1]["cout"]

    # ---- pack all weights/biases into two arrays (3 input DMAs total) ------
    kc_max = max(l["ksz"] * l["cin"] for l in layers)
    offs, rows = [], 0
    for l in layers:
        offs.append(rows)
        rows += _round_up(l["cout"], 8)               # sublane-aligned blocks
    w_all = jnp.zeros((rows, kc_max), jnp.float32)
    b_all = jnp.zeros((rows, 1), jnp.float32)
    for off, l in zip(offs, layers):
        w_all = w_all.at[off:off + l["cout"], :l["ksz"] * l["cin"]].set(
            l["w_kernel"])
        b_all = b_all.at[off:off + l["cout"], 0].set(l["b"])

    # ---- batch-in-lanes input layout: (C, B*t_buf), zero-padded segments ---
    x_pad = jnp.pad(x_ncw, ((0, 0), (0, 0), (0, t_buf - T)))
    x2d = jnp.transpose(x_pad, (1, 0, 2)).reshape(cin0, width)

    kernel = _make_fused_kernel(tuple(cfgs), batch=B, t_buf=t_buf,
                                w_row_offsets=tuple(offs))
    vmem = pl.BlockSpec(memory_space=pltpu.MemorySpace.VMEM)
    out2d = pl.pallas_call(
        kernel,
        out_shape=jax.ShapeDtypeStruct((cout_f, width), jnp.float32),
        in_specs=[vmem, vmem, vmem],
        out_specs=vmem,
    )(x2d, w_all, b_all)

    # Free layout plumbing: un-fold the batch segments and slice valid lanes.
    out = out2d.reshape(cout_f, B, t_buf).transpose(1, 0, 2)[:, :, :t_out_final]
    return out


def discriminator_forward_ref(x_ncw, layers):
    """Pure-JAX reference (lax.conv_general_dilated) for correctness check."""
    x = x_ncw
    for l in layers:
        y = lax.conv_general_dilated(
            x, l["w_torch"],
            window_strides=(1,),
            padding=[(l["padding"], l["padding"])],
            rhs_dilation=(l["dilation"],),
            dimension_numbers=("NCH", "OIH", "NCH"),
        )
        y = y + l["b"][None, :, None]
        if l["lrelu"]:
            y = jnp.where(y > 0, y, 0.2 * y)
        x = y
    return x


if __name__ == "__main__":
    # Module hyperparameters (small, consistent with the PyTorch __init__).
    in_channels = 1
    out_channels = 1
    inner_channels = 32
    n_layers = 4
    kernel_size = 3
    # use_weight_norm: folded into effective weights; dropout: identity.

    B, T = 2, 64

    key = jax.random.PRNGKey(0)
    key, kx = jax.random.split(key)
    x = jax.random.normal(kx, (B, in_channels, T), jnp.float32)  # (B, 1, T)

    layers = make_discriminator_params(key, in_channels, out_channels,
                                       inner_channels, n_layers, kernel_size)

    out = discriminator_forward(x, layers)
    out = jax.block_until_ready(out)

    ref = discriminator_forward_ref(x, layers)
    ref = jax.block_until_ready(ref)

    assert out.shape == ref.shape, (out.shape, ref.shape)
    assert jnp.allclose(out, ref, atol=1e-4, rtol=1e-4), (
        float(jnp.max(jnp.abs(out - ref))))

    print("KERNEL_OK")
</pallas_src>

<mosaic_0001>
module attributes {stable_mosaic.version = 11 : i64} {
  func.func @kernel(%arg0: memref<1x256xf32, #tpu.memory_space<vmem>>, %arg1: memref<104x96xf32, #tpu.memory_space<vmem>>, %arg2: memref<104x1xf32, #tpu.memory_space<vmem>>, %arg3: memref<1x256xf32, #tpu.memory_space<vmem>>) attributes {dimension_semantics = [], scalar_prefetch = 0 : i64, scratch_operands = 0 : i64, tpu.core_type = #tpu.core_type<tc>} {
    %c0 = arith.constant 0 : index
    %c0_0 = arith.constant 0 : index
    %0 = vector.load %arg0[%c0, %c0_0] : memref<1x256xf32, #tpu.memory_space<vmem>>, vector<1x256xf32>
    %1 = tpu.iota {dimensions = array<i32: 1>} : vector<1x256xi32>
    %c0_1 = arith.constant 0 : index
    %c0_2 = arith.constant 0 : index
    %2 = vector.load %arg1[%c0_1, %c0_2] : memref<104x96xf32, #tpu.memory_space<vmem>>, vector<32x96xf32>
    %c0_3 = arith.constant 0 : index
    %c0_4 = arith.constant 0 : index
    %3 = vector.load %arg2[%c0_3, %c0_4] : memref<104x1xf32, #tpu.memory_space<vmem>>, vector<32x1xf32>
    %c1_i32 = arith.constant 1 : i32
    %4 = tpu.dynamic_rotate %0 by %c1_i32 dim 1 : vector<1x256xf32>, i32 -> vector<1x256xf32>
    %c255_i32 = arith.constant 255 : i32
    %5 = tpu.dynamic_rotate %0 by %c255_i32 dim 1 : vector<1x256xf32>, i32 -> vector<1x256xf32>
    %6 = vector.extract_strided_slice %2 {offsets = [0, 0], sizes = [32, 1], strides = [1, 1]} : vector<32x96xf32> to vector<32x1xf32>
    %7 = vector.broadcast %6 : vector<32x1xf32> to vector<32x256xf32>
    %8 = vector.broadcast %4 : vector<1x256xf32> to vector<32x256xf32>
    %9 = arith.mulf %7, %8 : vector<32x256xf32>
    %10 = vector.extract_strided_slice %2 {offsets = [0, 1], sizes = [32, 1], strides = [1, 1]} : vector<32x96xf32> to vector<32x1xf32>
    %11 = vector.broadcast %10 : vector<32x1xf32> to vector<32x256xf32>
    %12 = vector.broadcast %0 : vector<1x256xf32> to vector<32x256xf32>
    %13 = arith.mulf %11, %12 : vector<32x256xf32>
    %14 = arith.addf %9, %13 : vector<32x256xf32>
    %15 = vector.extract_strided_slice %2 {offsets = [0, 2], sizes = [32, 1], strides = [1, 1]} : vector<32x96xf32> to vector<32x1xf32>
    %16 = vector.broadcast %15 : vector<32x1xf32> to vector<32x256xf32>
    %17 = vector.broadcast %5 : vector<1x256xf32> to vector<32x256xf32>
    %18 = arith.mulf %16, %17 : vector<32x256xf32>
    %19 = arith.addf %14, %18 : vector<32x256xf32>
    %20 = vector.broadcast %3 : vector<32x1xf32> to vector<32x256xf32>
    %21 = arith.addf %19, %20 : vector<32x256xf32>
    %cst = arith.constant 2.000000e-01 : f32
    %22 = vector.broadcast %cst : f32 to vector<32x256xf32>
    %23 = arith.mulf %22, %21 : vector<32x256xf32>
    %24 = arith.maximumf %21, %23 : vector<32x256xf32>
    %c0_i32 = arith.constant 0 : i32
    %25 = vector.broadcast %c0_i32 : i32 to vector<1x256xi32>
    %26 = arith.cmpi sge, %1, %25 : vector<1x256xi32>
    %c64_i32 = arith.constant 64 : i32
    %27 = vector.broadcast %c64_i32 : i32 to vector<1x256xi32>
    %28 = arith.cmpi slt, %1, %27 : vector<1x256xi32>
    %29 = arith.andi %26, %28 : vector<1x256xi1>
    %30 = arith.extui %29 : vector<1x256xi1> to vector<1x256xi32>
    %31 = arith.sitofp %30 : vector<1x256xi32> to vector<1x256xf32>
    %c128_i32 = arith.constant 128 : i32
    %32 = vector.broadcast %c128_i32 : i32 to vector<1x256xi32>
    %33 = arith.cmpi sge, %1, %32 : vector<1x256xi32>
    %c192_i32 = arith.constant 192 : i32
    %34 = vector.broadcast %c192_i32 : i32 to vector<1x256xi32>
    %35 = arith.cmpi slt, %1, %34 : vector<1x256xi32>
    %36 = arith.andi %33, %35 : vector<1x256xi1>
    %37 = arith.extui %36 : vector<1x256xi1> to vector<1x256xi32>
    %38 = arith.sitofp %37 : vector<1x256xi32> to vector<1x256xf32>
    %39 = arith.addf %31, %38 : vector<1x256xf32>
    %40 = vector.broadcast %39 : vector<1x256xf32> to vector<32x256xf32>
    %41 = arith.mulf %24, %40 : vector<32x256xf32>
    %c32 = arith.constant 32 : index
    %c0_5 = arith.constant 0 : index
    %42 = vector.load %arg1[%c32, %c0_5] : memref<104x96xf32, #tpu.memory_space<vmem>>, vector<32x96xf32>
    %c32_6 = arith.constant 32 : index
    %c0_7 = arith.constant 0 : index
    %43 = vector.load %arg2[%c32_6, %c0_7] : memref<104x1xf32, #tpu.memory_space<vmem>>, vector<32x1xf32>
    %c1_i32_8 = arith.constant 1 : i32
    %44 = tpu.dynamic_rotate %41 by %c1_i32_8 dim 1 : vector<32x256xf32>, i32 -> vector<32x256xf32>
    %c255_i32_9 = arith.constant 255 : i32
    %45 = tpu.dynamic_rotate %41 by %c255_i32_9 dim 1 : vector<32x256xf32>, i32 -> vector<32x256xf32>
    %46 = tpu.concatenate %44, %41, %45 in 0 : vector<32x256xf32>, vector<32x256xf32>, vector<32x256xf32> -> vector<96x256xf32>
    %cst_10 = arith.constant dense<0.000000e+00> : vector<32x256xf32>
    %47 = tpu.matmul %42, %46, %cst_10 {dimension_numbers = #tpu.dot_dimension_numbers<[1], [0], [0], [1], [0, 0, 1, 1], [], []>} : vector<32x96xf32>, vector<96x256xf32>, vector<32x256xf32> -> vector<32x256xf32>
    %48 = vector.broadcast %43 : vector<32x1xf32> to vector<32x256xf32>
    %49 = arith.addf %47, %48 : vector<32x256xf32>
    %cst_11 = arith.constant 2.000000e-01 : f32
    %50 = vector.broadcast %cst_11 : f32 to vector<32x256xf32>
    %51 = arith.mulf %50, %49 : vector<32x256xf32>
    %52 = arith.maximumf %49, %51 : vector<32x256xf32>
    %53 = vector.broadcast %39 : vector<1x256xf32> to vector<32x256xf32>
    %54 = arith.mulf %52, %53 : vector<32x256xf32>
    %c64 = arith.constant 64 : index
    %c0_12 = arith.constant 0 : index
    %55 = vector.load %arg1[%c64, %c0_12] : memref<104x96xf32, #tpu.memory_space<vmem>>, vector<32x96xf32>
    %c64_13 = arith.constant 64 : index
    %c0_14 = arith.constant 0 : index
    %56 = vector.load %arg2[%c64_13, %c0_14] : memref<104x1xf32, #tpu.memory_space<vmem>>, vector<32x1xf32>
    %c2_i32 = arith.constant 2 : i32
    %57 = tpu.dynamic_rotate %54 by %c2_i32 dim 1 : vector<32x256xf32>, i32 -> vector<32x256xf32>
    %c254_i32 = arith.constant 254 : i32
    %58 = tpu.dynamic_rotate %54 by %c254_i32 dim 1 : vector<32x256xf32>, i32 -> vector<32x256xf32>
    %59 = tpu.concatenate %57, %54, %58 in 0 : vector<32x256xf32>, vector<32x256xf32>, vector<32x256xf32> -> vector<96x256xf32>
    %cst_15 = arith.constant dense<0.000000e+00> : vector<32x256xf32>
    %60 = tpu.matmul %55, %59, %cst_15 {dimension_numbers = #tpu.dot_dimension_numbers<[1], [0], [0], [1], [0, 0, 1, 1], [], []>} : vector<32x96xf32>, vector<96x256xf32>, vector<32x256xf32> -> vector<32x256xf32>
    %61 = vector.broadcast %56 : vector<32x1xf32> to vector<32x256xf32>
    %62 = arith.addf %60, %61 : vector<32x256xf32>
    %cst_16 = arith.constant 2.000000e-01 : f32
    %63 = vector.broadcast %cst_16 : f32 to vector<32x256xf32>
    %64 = arith.mulf %63, %62 : vector<32x256xf32>
    %65 = arith.maximumf %62, %64 : vector<32x256xf32>
    %66 = vector.broadcast %39 : vector<1x256xf32> to vector<32x256xf32>
    %67 = arith.mulf %65, %66 : vector<32x256xf32>
    %c96 = arith.constant 96 : index
    %c0_17 = arith.constant 0 : index
    %68 = vector.load %arg1[%c96, %c0_17] : memref<104x96xf32, #tpu.memory_space<vmem>>, vector<1x96xf32>
    %c96_18 = arith.constant 96 : index
    %c0_19 = arith.constant 0 : index
    %69 = vector.load %arg2[%c96_18, %c0_19] : memref<104x1xf32, #tpu.memory_space<vmem>>, vector<1x1xf32>
    %c2_i32_20 = arith.constant 2 : i32
    %70 = tpu.dynamic_rotate %67 by %c2_i32_20 dim 1 : vector<32x256xf32>, i32 -> vector<32x256xf32>
    %c1_i32_21 = arith.constant 1 : i32
    %71 = tpu.dynamic_rotate %67 by %c1_i32_21 dim 1 : vector<32x256xf32>, i32 -> vector<32x256xf32>
    %72 = tpu.concatenate %70, %71, %67 in 0 : vector<32x256xf32>, vector<32x256xf32>, vector<32x256xf32> -> vector<96x256xf32>
    %cst_22 = arith.constant dense<0.000000e+00> : vector<1x256xf32>
    %73 = tpu.matmul %68, %72, %cst_22 {dimension_numbers = #tpu.dot_dimension_numbers<[1], [0], [0], [1], [0, 0, 1, 1], [], []>} : vector<1x96xf32>, vector<96x256xf32>, vector<1x256xf32> -> vector<1x256xf32>
    %74 = vector.broadcast %69 : vector<1x1xf32> to vector<1x256xf32>
    %75 = arith.addf %73, %74 : vector<1x256xf32>
    %c0_23 = arith.constant 0 : index
    %c0_24 = arith.constant 0 : index
    %76 = vector.load %arg3[%c0_23, %c0_24] : memref<1x256xf32, #tpu.memory_space<vmem>>, vector<1x256xf32>
    tpu.vector_store %arg3[%c0_23, %c0_24], %75 {strides = array<i32>} : memref<1x256xf32, #tpu.memory_space<vmem>>, vector<1x256xf32>,
    return
  }
}

</mosaic_0001>

<bundles_post_ra>
// kernel: tpu_custom_call.1
= control target key start
LH: loop header
LB: loop body
LE: loop exit
PB: predicated region body
PF: predicated region fallthrough
CT: control target
= control target key end

     0   :  { %v16_v1 = vlaneseq  ;;  %v1050_v2 = vmov 1   ;;  %v1051_v3 = vmov 2   ;;  %s1514_s0 = inlined_call_operand.vmem [shape: f32[1,256], index: 0, kind: input, shape index: {}]   ;;  %s1515_s1 = inlined_call_operand.vmem [shape: f32[104,96], index: 1, kind: input, shape index: {}]   ;;  %s1516_s2 = inlined_call_operand.vmem [shape: f32[104,1], index: 2, kind: input, shape index: {}]   ;;  %s1517_s3 = inlined_call_operand.hbm [shape: f32[1,256], index: 3, kind: output, shape index: {}]  }
   0x1   :  { %v19_v0 = vld [vmem:[%s1515_s1] sm:$0xff]  ;;  %898 = vset.pattern.permute.xlu1 %v1050_v2  ;;  %899 = vset.pattern.permute.xlu0 %v1051_v3  ;;  %v20_v5 = vld [vmem:[%s1515_s1 + $0x8] sm:$0xff] }
   0x2   :  { %89 = vperm.xlu1 %898, %v19_v0   ;;  %121 = vperm.xlu0 %899, %v19_v0   ;;  %v1084_v4 = vshrl.u32 %v16_v1, 7  ;;  %v15_v6 = vld [vmem:[%s1514_s0] sm:$0x3] }
   0x3   :  { %8 = vsyncpa [#allocation3], 0  ;;  %s1052_s18 = smov 1   ;;  %s1053_s19 = smov 127   ;;  %v21_v11 = vld [vmem:[%s1515_s1 + $0x10] sm:$0xff]  ;;  %v1054_v12 = vmov 0  }
   0x4   :  { %v1093_v7 = vsub.s32 0, %v1084_v4  ;;  %v34_v8 = vsub.s32 1, %v1084_v4  ;;  %v22_v13 = vld [vmem:[%s1515_s1 + $0x18] sm:$0xff]  ;;  %v24_v14 = vld [vmem:[%s1516_s2 + $0x8] sm:$0xff]  ;;  %v1055_v15 = vmov 0.0   ;;  %v23_v16 = vld [vmem:[%s1516_s2] sm:$0xff] }
   0x5   :  { %387 = vmatprep.mubr.f32.mxu0 %v1055_v15  ;;  %590 = vmatprep.mubr.f32.mxu1 %v1055_v15  ;;  %v25_v17 = vld [vmem:[%s1516_s2 + $0x10] sm:$0xff]  ;;  %v26_v18 = vld [vmem:[%s1516_s2 + $0x18] sm:$0xff]  ;;  %v1130_v27 = vand.u32 127, %v16_v1  ;;  %vm310_vm4 = vcmask 785408   ;;  %s1056_s20 = smov 2   ;;  %s1057_s21 = smov 126  }
   0x6   :  { %93 = vperm.xlu1 %898, %v20_v5   ;;  %v1096_v9 = vrot.slane %v15_v6, %v34_v8  ;;  %v1101_v10 = vrot.slane %v15_v6, %v1093_v7  ;;  %s1059_s13 = smov [#allocation2]   ;;  %vm788_vm7 = vcmp.lt.s32.totalorder %v16_v1, 256 }
   0x7   :  { %vm42_vm0 = vcmp.lt.s32.totalorder %v1130_v27, 1  ;;  %v18_v35 = vadd.s32 128, %v1130_v27  ;;  %vm49_vm1 = vcmp.lt.s32.totalorder %v1130_v27, 127  ;;  %vm206_vm2 = vcmp.lt.s32.totalorder %v1130_v27, 64  ;;  %s797_s14 = sshll.u32 %s1059_s13, 4  ;;  %s798_s14 = int_to_ptr.vmem [resolvable:$true] %s797_s14 }
   0x8   :  { %40 = vrot.lane.b32.xlu0 %v1096_v9, %s1052_s18  ;;  %v1155_v61 = vsel %vm206_vm2, 1.0, %v1055_v15  ;;  %vm460_vm5 = vcmp.lt.s32.totalorder %v1130_v27, 2  ;;  %vm485_vm6 = vcmp.lt.s32.totalorder %v1130_v27, 126  ;;  %v639_v27 = vld [vmem:[%s1515_s1 + $0x60] sm:$0x1]  ;;  %p1031_p1 = scmp.lt.s32.totalorder %s798_s14, %s798_s14 }
   0x9   :  { %vm217_vm3 = vcmp.lt.s32.totalorder %v18_v35, 192 }
   0xa   :  { %900 = vset.pattern.permute.xlu1 %v1051_v3  ;;  %v1159_v62 = vsel %vm217_vm3, 1.0, %v1055_v15 }
   0xb   :  { %125 = vperm.xlu1 %900, %v20_v5  }
   0xc   :  { %45 = vrot.lane.b32.xlu0 %v1101_v10, %s1053_s19 }
   0xf   :  { %38 = vrot.lane.b32.xlu1 %v1101_v10, %s1052_s18 }
  0x10   :  { %129 = vperm.xlu0 %899, %v21_v11   ;;  %901 = vset.pattern.permute.xlu1 %v1054_v12 }
  0x13   :  { %64 = vperm.xlu1 %901, %v21_v11  }
  0x14   :  { %903 = vset.pattern.permute.xlu0 %v1054_v12 }
  0x15   :  { %54 = vperm.xlu0 %903, %v19_v0  }
  0x17   :  { %902 = vset.pattern.permute.xlu1 %v1050_v2 }
  0x18   :  { %97 = vperm.xlu1 %902, %v21_v11  }
  0x19   :  { %59 = vperm.xlu0 %903, %v20_v5  }
  0x1c   :  { %101 = vperm.xlu1 %902, %v22_v13  }
  0x1d   :  { %69 = vperm.xlu0 %903, %v22_v13  }
  0x20   :  { %47 = vrot.lane.b32.xlu1 %v1096_v9, %s1053_s19 }
  0x21   :  { %167 = vperm.xlu0 %903, %v24_v14   ;;  %904 = vset.pattern.permute.xlu1 %v1051_v3 }
  0x24   :  { %133 = vperm.xlu1 %904, %v22_v13  }
  0x28   :  { %905 = vset.pattern.permute.xlu1 %v1054_v12 }
  0x29   :  { %162 = vperm.xlu1 %905, %v23_v16  }
  0x2d   :  { %172 = vperm.xlu1 %905, %v25_v17  }
  0x31   :  { %177 = vperm.xlu1 %905, %v26_v18  }
  0x81   :  { %v90_v19 = vpop.permute.xlu1 %89  ;;  %v122_v20 = vpop.permute.xlu0 %121 }
  0x82   :  { %v104_v50 = vmul.f32 %v90_v19, %v1101_v10  ;;  %v105_v51 = vmul.f32 %v90_v19, %v1096_v9 }
  0x85   :  { %v94_v21 = vpop.permute.xlu1 %93  ;;  %v41_v22 = vpop.permute.xlu0 %40 }
  0x86   :  { %v106_v41 = vmul.f32 %v94_v21, %v1101_v10  ;;  %v107_v42 = vmul.f32 %v94_v21, %v1096_v9 }
  0x89   :  { %v46_v23 = vpop.permute.xlu0 %45 }
  0x8a   :  { %v126_v24 = vpop.permute.xlu1 %125 }
  0x8e   :  { %v39_v25 = vpop.permute.xlu1 %38 }
  0x8f   :  { %v130_v26 = vpop.permute.xlu0 %129  ;;  %v43_v31 = vsel %vm42_vm0, %v39_v25, %v41_v22  ;;  %v44_v32 = vsel %vm42_vm0, %v41_v22, %v39_v25 }
  0x90   :  { %v75_v36 = vrot.slane %v44_v32, %v1093_v7  ;;  %v79_v37 = vrot.slane %v43_v31, %v1093_v7 }
  0x92   :  { %v65_v28 = vpop.permute.xlu1 %64 }
  0x93   :  { %v84_v59 = vmul.f32 %v75_v36, %v65_v28  ;;  %v85_v60 = vmul.f32 %v79_v37, %v65_v28 }
  0x94   :  { %v55_v29 = vpop.permute.xlu0 %54 }
  0x95   :  { %v80_v46 = vmul.f32 %v75_v36, %v55_v29  ;;  %v81_v47 = vmul.f32 %v79_v37, %v55_v29 }
  0x97   :  { %v98_v30 = vpop.permute.xlu1 %97  ;;  %v112_v63 = vadd.f32 %v104_v50, %v80_v46  ;;  %v113_v0 = vadd.f32 %v105_v51, %v81_v47 }
  0x98   :  { %v60_v33 = vpop.permute.xlu0 %59  ;;  %v108_v5 = vmul.f32 %v98_v30, %v1101_v10  ;;  %v109_v6 = vmul.f32 %v98_v30, %v1096_v9 }
  0x99   :  { %v82_v38 = vmul.f32 %v75_v36, %v60_v33  ;;  %v83_v39 = vmul.f32 %v79_v37, %v60_v33 }
  0x9a   :  { %v116_v28 = vadd.f32 %v108_v5, %v84_v59  ;;  %v117_v29 = vadd.f32 %v109_v6, %v85_v60 }
  0x9b   :  { %v102_v34 = vpop.permute.xlu1 %101  ;;  %v114_v52 = vadd.f32 %v106_v41, %v82_v38  ;;  %v115_v53 = vadd.f32 %v107_v42, %v83_v39 }
  0x9c   :  { %v70_v43 = vpop.permute.xlu0 %69  ;;  %v111_v8 = vmul.f32 %v102_v34, %v1096_v9 }
  0x9d   :  { %v86_v17 = vmul.f32 %v75_v36, %v70_v43  ;;  %v87_v18 = vmul.f32 %v79_v37, %v70_v43 }
  0x9f   :  { %v48_v40 = vpop.permute.xlu1 %47  ;;  %v119_v35 = vadd.f32 %v111_v8, %v87_v18 }
  0xa0   :  { %v50_v44 = vsel %vm49_vm1, %v46_v23, %v48_v40  ;;  %v51_v45 = vsel %vm49_vm1, %v48_v40, %v46_v23  ;;  %v168_v11 = vpop.permute.xlu0 %167 }
  0xa1   :  { %v139_v48 = vrot.slane %v50_v44, %v1093_v7  ;;  %v143_v49 = vrot.slane %v51_v45, %v1093_v7  ;;  %v110_v7 = vmul.f32 %v102_v34, %v1101_v10 }
  0xa3   :  { %v146_v54 = vmul.f32 %v139_v48, %v126_v24  ;;  %v147_v55 = vmul.f32 %v143_v49, %v126_v24  ;;  %v134_v56 = vpop.permute.xlu1 %133  ;;  %v144_v57 = vmul.f32 %v139_v48, %v122_v20  ;;  %v145_v58 = vmul.f32 %v143_v49, %v122_v20 }
  0xa4   :  { %v148_v20 = vmul.f32 %v139_v48, %v130_v26  ;;  %v149_v21 = vmul.f32 %v143_v49, %v130_v26  ;;  %v150_v30 = vmul.f32 %v139_v48, %v134_v56  ;;  %v151_v10 = vmul.f32 %v143_v49, %v134_v56 }
  0xa5   :  { %v154_v2 = vadd.f32 %v146_v54, %v114_v52  ;;  %v155_v3 = vadd.f32 %v147_v55, %v115_v53  ;;  %v153_v14 = vadd.f32 %v145_v58, %v113_v0  ;;  %v152_v16 = vadd.f32 %v144_v57, %v112_v63 }
  0xa6   :  { %v118_v34 = vadd.f32 %v110_v7, %v86_v17  ;;  %v156_v38 = vadd.f32 %v148_v20, %v116_v28  ;;  %v157_v36 = vadd.f32 %v149_v21, %v117_v29  ;;  %v159_v43 = vadd.f32 %v151_v10, %v119_v35  ;;  %v240_v17 = vld [vmem:[%s1516_s2 + $0x30] sm:$0xff] }
  0xa7   :  { %v182_v12 = vadd.f32 %v168_v11, %v154_v2  ;;  %v183_v13 = vadd.f32 %v168_v11, %v155_v3 }
  0xa8   :  { %v163_v19 = vpop.permute.xlu1 %162  ;;  %v158_v42 = vadd.f32 %v150_v30, %v118_v34 }
  0xa9   :  { %v190_v22 = vmul.f32 0.2, %v182_v12  ;;  %v191_v23 = vmul.f32 0.2, %v183_v13  ;;  %v180_v24 = vadd.f32 %v163_v19, %v152_v16  ;;  %v181_v25 = vadd.f32 %v163_v19, %v153_v14  ;;  %v238_v14 = vld [vmem:[%s1516_s2 + $0x20] sm:$0xff]  ;;  %v241_v16 = vld [vmem:[%s1516_s2 + $0x38] sm:$0xff] }
  0xab   :  { %v198_v31 = vmax.f32 %v182_v12, %v190_v22  ;;  %v199_v9 = vmax.f32 %v183_v13, %v191_v23  ;;  %v188_v32 = vmul.f32 0.2, %v180_v24  ;;  %v189_v33 = vmul.f32 0.2, %v181_v25  ;;  %v239_v13 = vld [vmem:[%s1516_s2 + $0x28] sm:$0xff] }
  0xac   :  { %v173_v37 = vpop.permute.xlu1 %172 }
  0xad   :  { %v196_v39 = vmax.f32 %v180_v24, %v188_v32  ;;  %v197_v40 = vmax.f32 %v181_v25, %v189_v33  ;;  %v184_v26 = vadd.f32 %v173_v37, %v156_v38  ;;  %v185_v41 = vadd.f32 %v173_v37, %v157_v36 }
  0xae   :  { %v1166_v44 = vmul.f32 %v1155_v61, %v198_v31  ;;  %v1169_v45 = vmul.f32 %v1159_v62, %v199_v9 }
  0xaf   :  { %v1172_v46 = vmul.f32 %v1155_v61, %v196_v39  ;;  %v1175_v47 = vmul.f32 %v1159_v62, %v197_v40  ;;  %v192_v48 = vmul.f32 0.2, %v184_v26  ;;  %v193_v49 = vmul.f32 0.2, %v185_v41 }
  0xb0   :  { %v178_v50 = vpop.permute.xlu1 %177 }
  0xb1   :  { %v186_v51 = vadd.f32 %v178_v50, %v158_v42  ;;  %v187_v52 = vadd.f32 %v178_v50, %v159_v43  ;;  %v911_v53 = vpack.i.bf16 %v1169_v45, %v1175_v47  ;;  %v906_v54 = vpack.i.bf16 %v1166_v44, %v1172_v46 }
  0xb2   :  { %v200_v55 = vmax.f32 %v184_v26, %v192_v48  ;;  %v201_v56 = vmax.f32 %v185_v41, %v193_v49  ;;  %v824_v59 = vpack.c.bf16 %v1169_v45, %v1175_v47  ;;  %v826_v60 = vpack.c.bf16 %v1166_v44, %v1172_v46 }
  0xb3   :  { %v194_v57 = vmul.f32 0.2, %v186_v51  ;;  %v195_v58 = vmul.f32 0.2, %v187_v52  ;;  %912 = vrot.lane.b32.xlu1 %v911_v53, %s1052_s18  ;;  %907 = vrot.lane.b32.xlu0 %v906_v54, %s1052_s18 }
  0xb4   :  { %v1188_v2 = vmul.f32 %v1155_v61, %v200_v55  ;;  %v1191_v3 = vmul.f32 %v1159_v62, %v201_v56 }
  0xb5   :  { %v202_v63 = vmax.f32 %v186_v51, %v194_v57  ;;  %v203_v0 = vmax.f32 %v187_v52, %v195_v58 }
  0xb7   :  { %v1194_v5 = vmul.f32 %v1155_v61, %v202_v63  ;;  %v1197_v6 = vmul.f32 %v1159_v62, %v203_v0 }
  0xb9   :  { %v921_v7 = vpack.i.bf16 %v1197_v6, %v1191_v3  ;;  %v916_v8 = vpack.i.bf16 %v1194_v5, %v1188_v2  ;;  %v828_v11 = vpack.c.bf16 %v1197_v6, %v1191_v3  ;;  %v830_v12 = vpack.c.bf16 %v1194_v5, %v1188_v2  ;;  %v234_v2 = vld [vmem:[%s1515_s1 + $0x20] sm:$0xff]  ;;  %v235_v5 = vld [vmem:[%s1515_s1 + $0x28] sm:$0xff] }
  0xbb   :  { %922 = vrot.lane.b32.xlu1 %v921_v7, %s1052_s18  ;;  %917 = vrot.lane.b32.xlu0 %v916_v8, %s1052_s18 }
  0xbf   :  { %932 = vrot.lane.b32.xlu1 %v911_v53, %s1053_s19  ;;  %927 = vrot.lane.b32.xlu0 %v906_v54, %s1053_s19 }
  0xc3   :  { %942 = vrot.lane.b32.xlu1 %v921_v7, %s1053_s19  ;;  %937 = vrot.lane.b32.xlu0 %v916_v8, %s1053_s19  ;;  %v236_v7 = vld [vmem:[%s1515_s1 + $0x30] sm:$0xff]  ;;  %v237_v8 = vld [vmem:[%s1515_s1 + $0x38] sm:$0xff] }
  0xc7   :  { %297 = vperm.xlu1 %905, %v239_v13   ;;  %292 = vperm.xlu0 %903, %v238_v14  }
  0xcb   :  { %307 = vperm.xlu1 %905, %v241_v16   ;;  %302 = vperm.xlu0 %903, %v240_v17  }
 0x125   :  { %v913_v18 = vpop.permute.xlu1 %912  ;;  %v908_v19 = vpop.permute.xlu0 %907 }
 0x126   :  { %v915_v20 = vunpack.i.h.bf16 %v913_v18  ;;  %v914_v21 = vunpack.i.l.bf16 %v913_v18  ;;  %v910_v22 = vunpack.i.h.bf16 %v908_v19  ;;  %v909_v23 = vunpack.i.l.bf16 %v908_v19 }
 0x128   :  { %v258_v24 = vsel %vm42_vm0, %v909_v23, %v914_v21  ;;  %v259_v25 = vsel %vm42_vm0, %v910_v22, %v915_v20  ;;  %v262_v28 = vsel %vm42_vm0, %v914_v21, %v909_v23  ;;  %v263_v29 = vsel %vm42_vm0, %v915_v20, %v910_v22 }
 0x129   :  { %v816_v30 = vpack.c.bf16 %v259_v25, %v258_v24  ;;  %v818_v10 = vpack.c.bf16 %v263_v29, %v262_v28 }
 0x12b   :  { %817 = vmatprep.subr.bf16.mxu0 %v816_v30 }
 0x12c   :  { %819 = vmatpush1.bf16.msra.mxu0 %v818_v10 }
 0x12d   :  { %v923_v31 = vpop.permute.xlu1 %922  ;;  %v918_v9 = vpop.permute.xlu0 %917 }
 0x12e   :  { %v925_v32 = vunpack.i.h.bf16 %v923_v31  ;;  %v924_v33 = vunpack.i.l.bf16 %v923_v31  ;;  %v920_v34 = vunpack.i.h.bf16 %v918_v9  ;;  %v919_v35 = vunpack.i.l.bf16 %v918_v9 }
 0x130   :  { %v260_v38 = vsel %vm42_vm0, %v919_v35, %v924_v33  ;;  %v261_v36 = vsel %vm42_vm0, %v920_v34, %v925_v32  ;;  %v264_v37 = vsel %vm42_vm0, %v924_v33, %v919_v35  ;;  %v265_v39 = vsel %vm42_vm0, %v925_v32, %v920_v34 }
 0x131   :  { %v933_v40 = vpop.permute.xlu1 %932  ;;  %v928_v26 = vpop.permute.xlu0 %927  ;;  %v820_v41 = vpack.c.bf16 %v261_v36, %v260_v38  ;;  %v822_v42 = vpack.c.bf16 %v265_v39, %v264_v37 }
 0x132   :  { %v935_v43 = vunpack.i.h.bf16 %v933_v40  ;;  %v934_v45 = vunpack.i.l.bf16 %v933_v40  ;;  %v930_v47 = vunpack.i.h.bf16 %v928_v26  ;;  %v929_v48 = vunpack.i.l.bf16 %v928_v26 }
 0x133   :  { %821 = vmatprep.subr.bf16.mxu0 %v820_v41 }
 0x134   :  { %823 = vmatpush1.bf16.msra.mxu0 %v822_v42  ;;  %v286_v51 = vsel %vm49_vm1, %v934_v45, %v929_v48  ;;  %v287_v52 = vsel %vm49_vm1, %v935_v43, %v930_v47  ;;  %v282_v58 = vsel %vm49_vm1, %v929_v48, %v934_v45 }
 0x135   :  { %v943_v49 = vpop.permute.xlu1 %942  ;;  %v938_v50 = vpop.permute.xlu0 %937  ;;  %825 = vmatprep.subr.bf16.mxu0 %v824_v59  ;;  %v832_v57 = vpack.c.bf16 %v287_v52, %v286_v51  ;;  %v283_v59 = vsel %vm49_vm1, %v930_v47, %v935_v43 }
 0x136   :  { %v945_v53 = vunpack.i.h.bf16 %v943_v49  ;;  %v944_v54 = vunpack.i.l.bf16 %v943_v49  ;;  %v940_v55 = vunpack.i.h.bf16 %v938_v50  ;;  %v939_v56 = vunpack.i.l.bf16 %v938_v50 }
 0x137   :  { %v834_v44 = vpack.c.bf16 %v283_v59, %v282_v58 }
 0x138   :  { %827 = vmatpush1.bf16.msra.mxu0 %v826_v60  ;;  %v288_v63 = vsel %vm49_vm1, %v944_v54, %v939_v56  ;;  %v289_v0 = vsel %vm49_vm1, %v945_v53, %v940_v55  ;;  %v284_v60 = vsel %vm49_vm1, %v939_v56, %v944_v54  ;;  %v285_v3 = vsel %vm49_vm1, %v940_v55, %v945_v53 }
 0x139   :  { %829 = vmatprep.subr.bf16.mxu0 %v828_v11  ;;  %v836_v46 = vpack.c.bf16 %v289_v0, %v288_v63  ;;  %v838_v6 = vpack.c.bf16 %v285_v3, %v284_v60  ;;  %v440_v3 = vld [vmem:[%s1516_s2 + $0x40] sm:$0xff] }
 0x13c   :  { %831 = vmatpush1.bf16.msra.mxu0 %v830_v12 }
 0x13d   :  { %833 = vmatprep.subr.bf16.mxu0 %v832_v57 }
 0x140   :  { %835 = vmatpush1.bf16.msra.mxu0 %v834_v44 }
 0x141   :  { %837 = vmatprep.subr.bf16.mxu0 %v836_v46 }
 0x144   :  { %839 = vmatpush1.bf16.msra.mxu0 %v838_v6  ;;  %v441_v6 = vld [vmem:[%s1516_s2 + $0x48] sm:$0xff] }
 0x146   :  { %v293_v11 = vpop.permute.xlu0 %292  ;;  %v298_v18 = vpop.permute.xlu1 %297 }
 0x147   :  { %807 = vmatmul.mubr.msk.f32.vlgmr.msra.gmra.mrb[0].mxu0 %vm310_vm4, %v234_v2  ;;  %v442_v2 = vld [vmem:[%s1516_s2 + $0x50] sm:$0xff] }
 0x148   :  { %393 = vmatprep.mubr.f32.mxu0 %v1055_v15 }
 0x14a   :  { %v303_v28 = vpop.permute.xlu0 %302  ;;  %v308_v37 = vpop.permute.xlu1 %307 }
 0x14b   :  { %808 = vmatmul.mubr.msk.f32.gmra.mrb[2].mxu0 %vm310_vm4, %v235_v5  ;;  %v443_v5 = vld [vmem:[%s1516_s2 + $0x58] sm:$0xff] }
 0x14c   :  { %399 = vmatprep.mubr.f32.mxu0 %v1055_v15 }
 0x14f   :  { %809 = vmatmul.mubr.msk.f32.gmra.mrb[4].mxu0 %vm310_vm4, %v236_v7 }
 0x150   :  { %405 = vmatprep.mubr.f32.mxu0 %v1055_v15 }
 0x153   :  { %810 = vmatmul.mubr.msk.f32.gmra.mrb[6].mxu0 %vm310_vm4, %v237_v8 }
 0x154   :  { %761 = vmatprep.mubr.f32.mxu0 %v1055_v15 }
 0x21a   :  { %v389_v12 = vpop.f32.mrb[0].mxu0 }
 0x21b   :  { %v390_v13 = vadd.f32 %v389_v12, %v293_v11  ;;  %v391_v14 = vpop.f32.mrb[1].mxu0 }
 0x21c   :  { %v392_v16 = vadd.f32 %v391_v14, %v293_v11 }
 0x21d   :  { %v412_v17 = vmul.f32 0.2, %v390_v13 }
 0x21e   :  { %v413_v19 = vmul.f32 0.2, %v392_v16  ;;  %v395_v20 = vpop.f32.mrb[2].mxu0 }
 0x21f   :  { %v396_v21 = vadd.f32 %v395_v20, %v298_v18  ;;  %v397_v22 = vpop.f32.mrb[3].mxu0  ;;  %v420_v24 = vmax.f32 %v390_v13, %v412_v17 }
 0x220   :  { %v398_v23 = vadd.f32 %v397_v22, %v298_v18  ;;  %v421_v29 = vmax.f32 %v392_v16, %v413_v19 }
 0x221   :  { %v414_v25 = vmul.f32 0.2, %v396_v21  ;;  %v1284_v35 = vmul.f32 %v1155_v61, %v420_v24 }
 0x222   :  { %v415_v30 = vmul.f32 0.2, %v398_v23  ;;  %v401_v10 = vpop.f32.mrb[4].mxu0  ;;  %v1290_v39 = vmul.f32 %v1159_v62, %v421_v29 }
 0x223   :  { %v422_v31 = vmax.f32 %v396_v21, %v414_v25  ;;  %v402_v9 = vadd.f32 %v401_v10, %v303_v28  ;;  %v403_v32 = vpop.f32.mrb[5].mxu0 }
 0x224   :  { %v423_v33 = vmax.f32 %v398_v23, %v415_v30  ;;  %v404_v34 = vadd.f32 %v403_v32, %v303_v28 }
 0x225   :  { %v1287_v38 = vmul.f32 %v1155_v61, %v422_v31  ;;  %v416_v36 = vmul.f32 0.2, %v402_v9 }
 0x226   :  { %v1293_v40 = vmul.f32 %v1159_v62, %v423_v33  ;;  %v417_v26 = vmul.f32 0.2, %v404_v34  ;;  %v407_v41 = vpop.f32.mrb[6].mxu0 }
 0x227   :  { %v408_v42 = vadd.f32 %v407_v41, %v308_v37  ;;  %v409_v43 = vpop.f32.mrb[7].mxu0  ;;  %v946_v45 = vpack.i.bf16 %v1287_v38, %v1284_v35  ;;  %v424_v49 = vmax.f32 %v402_v9, %v416_v36  ;;  %v850_v52 = vpack.c.bf16 %v1287_v38, %v1284_v35 }
 0x228   :  { %v410_v47 = vadd.f32 %v409_v43, %v308_v37  ;;  %v951_v48 = vpack.i.bf16 %v1293_v40, %v1290_v39  ;;  %v848_v51 = vpack.c.bf16 %v1293_v40, %v1290_v39  ;;  %v425_v53 = vmax.f32 %v404_v34, %v417_v26 }
 0x229   :  { %v418_v50 = vmul.f32 0.2, %v408_v42  ;;  %947 = vrot.lane.b32.xlu0 %v946_v45, %s1056_s20  ;;  %v1306_v57 = vmul.f32 %v1155_v61, %v424_v49 }
 0x22a   :  { %v419_v54 = vmul.f32 0.2, %v410_v47  ;;  %952 = vrot.lane.b32.xlu1 %v951_v48, %s1056_s20  ;;  %v1312_v59 = vmul.f32 %v1159_v62, %v425_v53 }
 0x22b   :  { %v426_v55 = vmax.f32 %v408_v42, %v418_v50 }
 0x22c   :  { %v427_v56 = vmax.f32 %v410_v47, %v419_v54 }
 0x22d   :  { %v1309_v58 = vmul.f32 %v1155_v61, %v426_v55 }
 0x22e   :  { %v1315_v63 = vmul.f32 %v1159_v62, %v427_v56 }
 0x22f   :  { %v956_v0 = vpack.i.bf16 %v1309_v58, %v1306_v57  ;;  %v854_v44 = vpack.c.bf16 %v1309_v58, %v1306_v57  ;;  %v436_v57 = vld [vmem:[%s1515_s1 + $0x40] sm:$0xff]  ;;  %v437_v58 = vld [vmem:[%s1515_s1 + $0x48] sm:$0xff] }
 0x230   :  { %v961_v46 = vpack.i.bf16 %v1315_v63, %v1312_v59  ;;  %v852_v60 = vpack.c.bf16 %v1315_v63, %v1312_v59 }
 0x231   :  { %957 = vrot.lane.b32.xlu0 %v956_v0, %s1056_s20 }
 0x232   :  { %962 = vrot.lane.b32.xlu1 %v961_v46, %s1056_s20 }
 0x235   :  { %967 = vrot.lane.b32.xlu0 %v946_v45, %s1057_s21 }
 0x236   :  { %972 = vrot.lane.b32.xlu1 %v951_v48, %s1057_s21 }
 0x239   :  { %977 = vrot.lane.b32.xlu0 %v956_v0, %s1057_s21  ;;  %v438_v0 = vld [vmem:[%s1515_s1 + $0x50] sm:$0xff] }
 0x23a   :  { %982 = vrot.lane.b32.xlu1 %v961_v46, %s1057_s21 }
 0x23d   :  { %496 = vperm.xlu0 %903, %v440_v3  }
 0x23e   :  { %501 = vperm.xlu1 %905, %v441_v6  }
 0x241   :  { %506 = vperm.xlu0 %903, %v442_v2  }
 0x242   :  { %511 = vperm.xlu1 %905, %v443_v5  }
 0x29b   :  { %v948_v7 = vpop.permute.xlu0 %947 }
 0x29c   :  { %v950_v8 = vunpack.i.h.bf16 %v948_v7  ;;  %v949_v11 = vunpack.i.l.bf16 %v948_v7  ;;  %v953_v12 = vpop.permute.xlu1 %952 }
 0x29d   :  { %v955_v13 = vunpack.i.h.bf16 %v953_v12  ;;  %v954_v14 = vunpack.i.l.bf16 %v953_v12 }
 0x29f   :  { %v461_v16 = vsel %vm460_vm5, %v949_v11, %v954_v14  ;;  %v462_v17 = vsel %vm460_vm5, %v950_v8, %v955_v13  ;;  %v465_v18 = vsel %vm460_vm5, %v954_v14, %v949_v11  ;;  %v466_v19 = vsel %vm460_vm5, %v955_v13, %v950_v8 }
 0x2a0   :  { %v840_v20 = vpack.c.bf16 %v462_v17, %v461_v16  ;;  %v842_v21 = vpack.c.bf16 %v466_v19, %v465_v18 }
 0x2a2   :  { %841 = vmatprep.subr.bf16.mxu1 %v840_v20 }
 0x2a3   :  { %v958_v22 = vpop.permute.xlu0 %957  ;;  %843 = vmatpush1.bf16.msra.mxu1 %v842_v21 }
 0x2a4   :  { %v960_v23 = vunpack.i.h.bf16 %v958_v22  ;;  %v959_v24 = vunpack.i.l.bf16 %v958_v22  ;;  %v963_v25 = vpop.permute.xlu1 %962 }
 0x2a5   :  { %v965_v28 = vunpack.i.h.bf16 %v963_v25  ;;  %v964_v29 = vunpack.i.l.bf16 %v963_v25 }
 0x2a7   :  { %v968_v30 = vpop.permute.xlu0 %967  ;;  %v463_v10 = vsel %vm460_vm5, %v959_v24, %v964_v29  ;;  %v464_v31 = vsel %vm460_vm5, %v960_v23, %v965_v28  ;;  %v467_v9 = vsel %vm460_vm5, %v964_v29, %v959_v24  ;;  %v468_v32 = vsel %vm460_vm5, %v965_v28, %v960_v23 }
 0x2a8   :  { %v973_v33 = vpop.permute.xlu1 %972  ;;  %v844_v34 = vpack.c.bf16 %v464_v31, %v463_v10  ;;  %v846_v36 = vpack.c.bf16 %v468_v32, %v467_v9  ;;  %v970_v37 = vunpack.i.h.bf16 %v968_v30  ;;  %v969_v26 = vunpack.i.l.bf16 %v968_v30 }
 0x2a9   :  { %v975_v41 = vunpack.i.h.bf16 %v973_v33  ;;  %v974_v42 = vunpack.i.l.bf16 %v973_v33 }
 0x2aa   :  { %845 = vmatprep.subr.bf16.mxu1 %v844_v34 }
 0x2ab   :  { %847 = vmatpush1.bf16.msra.mxu1 %v846_v36  ;;  %v978_v43 = vpop.permute.xlu0 %977  ;;  %v490_v47 = vsel %vm485_vm6, %v974_v42, %v969_v26  ;;  %v491_v48 = vsel %vm485_vm6, %v975_v41, %v970_v37  ;;  %v486_v39 = vsel %vm485_vm6, %v969_v26, %v974_v42  ;;  %v487_v40 = vsel %vm485_vm6, %v970_v37, %v975_v41 }
 0x2ac   :  { %v983_v45 = vpop.permute.xlu1 %982  ;;  %849 = vmatprep.subr.bf16.mxu1 %v848_v51  ;;  %v980_v49 = vunpack.i.h.bf16 %v978_v43  ;;  %v979_v50 = vunpack.i.l.bf16 %v978_v43  ;;  %v856_v55 = vpack.c.bf16 %v491_v48, %v490_v47  ;;  %v858_v35 = vpack.c.bf16 %v487_v40, %v486_v39 }
 0x2ad   :  { %v985_v53 = vunpack.i.h.bf16 %v983_v45  ;;  %v984_v54 = vunpack.i.l.bf16 %v983_v45 }
 0x2af   :  { %851 = vmatpush1.bf16.msra.mxu1 %v850_v52  ;;  %v492_v51 = vsel %vm485_vm6, %v984_v54, %v979_v50  ;;  %v493_v56 = vsel %vm485_vm6, %v985_v53, %v980_v49  ;;  %v488_v52 = vsel %vm485_vm6, %v979_v50, %v984_v54  ;;  %v489_v59 = vsel %vm485_vm6, %v980_v49, %v985_v53 }
 0x2b0   :  { %853 = vmatprep.subr.bf16.mxu1 %v852_v60  ;;  %v860_v38 = vpack.c.bf16 %v493_v56, %v492_v51  ;;  %v862_v63 = vpack.c.bf16 %v489_v59, %v488_v52 }
 0x2b3   :  { %855 = vmatpush1.bf16.msra.mxu1 %v854_v44  ;;  %v439_v44 = vld [vmem:[%s1515_s1 + $0x58] sm:$0xff]  ;;  %s1026_s1 = scalar_lea.vmem %s798_s14, 32 }
 0x2b4   :  { %857 = vmatprep.subr.bf16.mxu1 %v856_v55  ;;  %p1027_p0 = scmp.ne.s32.totalorder %s798_s14, %s1026_s1  ;;  %p1032_p2 = scmp.lt.s32.totalorder %s1026_s1, %s1026_s1 }
 0x2b6   :  { %p1033_p3 = por %p1032_p2, %p1031_p1 }
 0x2b7   :  { %859 = vmatpush1.bf16.msra.mxu1 %v858_v35 }
 0x2b8   :  { %861 = vmatprep.subr.bf16.mxu1 %v860_v38  ;;  %p1034_p4 = pnand %p1033_p3, %p1027_p0 }
 0x2bb   :  { %863 = vmatpush1.bf16.msra.mxu1 %v862_v63 }
 0x2bc   :  { %v497_v46 = vpop.permute.xlu0 %496 }
 0x2bd   :  { %v502_v7 = vpop.permute.xlu1 %501 }
 0x2be   :  { %811 = vmatmul.mubr.msk.f32.vlgmr.msra.gmra.mrb[0].mxu1 %vm310_vm4, %v436_v57 }
 0x2bf   :  { %596 = vmatprep.mubr.f32.mxu1 %v1055_v15 }
 0x2c0   :  { %v507_v17 = vpop.permute.xlu0 %506 }
 0x2c1   :  { %v512_v10 = vpop.permute.xlu1 %511 }
 0x2c2   :  { %812 = vmatmul.mubr.msk.f32.gmra.mrb[2].mxu1 %vm310_vm4, %v437_v58 }
 0x2c3   :  { %602 = vmatprep.mubr.f32.mxu1 %v1055_v15 }
 0x2c6   :  { %813 = vmatmul.mubr.msk.f32.gmra.mrb[4].mxu1 %vm310_vm4, %v438_v0 }
 0x2c7   :  { %608 = vmatprep.mubr.f32.mxu1 %v1055_v15 }
 0x2ca   :  { %814 = vmatmul.mubr.msk.f32.gmra.mrb[6].mxu1 %vm310_vm4, %v439_v44 }
 0x391   :  { %v592_v60 = vpop.f32.mrb[0].mxu1 }
 0x392   :  { %v593_v3 = vadd.f32 %v592_v60, %v497_v46  ;;  %v594_v6 = vpop.f32.mrb[1].mxu1 }
 0x393   :  { %v595_v2 = vadd.f32 %v594_v6, %v497_v46 }
 0x394   :  { %v615_v5 = vmul.f32 0.2, %v593_v3 }
 0x395   :  { %v616_v8 = vmul.f32 0.2, %v595_v2  ;;  %v598_v11 = vpop.f32.mrb[2].mxu1 }
 0x396   :  { %v599_v12 = vadd.f32 %v598_v11, %v502_v7  ;;  %v600_v13 = vpop.f32.mrb[3].mxu1  ;;  %v623_v16 = vmax.f32 %v593_v3, %v615_v5 }
 0x397   :  { %v601_v14 = vadd.f32 %v600_v13, %v502_v7  ;;  %v624_v18 = vmax.f32 %v595_v2, %v616_v8 }
 0x398   :  { %v617_v15 = vmul.f32 0.2, %v599_v12  ;;  %v1402_v28 = vmul.f32 %v1155_v61, %v623_v16 }
 0x399   :  { %v618_v19 = vmul.f32 0.2, %v601_v14  ;;  %v604_v20 = vpop.f32.mrb[4].mxu1  ;;  %v1408_v31 = vmul.f32 %v1159_v62, %v624_v18 }
 0x39a   :  { %v625_v21 = vmax.f32 %v599_v12, %v617_v15  ;;  %v605_v22 = vadd.f32 %v604_v20, %v507_v17  ;;  %v606_v23 = vpop.f32.mrb[5].mxu1 }
 0x39b   :  { %v626_v24 = vmax.f32 %v601_v14, %v618_v19  ;;  %v607_v25 = vadd.f32 %v606_v23, %v507_v17 }
 0x39c   :  { %v1405_v29 = vmul.f32 %v1155_v61, %v625_v21  ;;  %v619_v30 = vmul.f32 0.2, %v605_v22 }
 0x39d   :  { %v1411_v9 = vmul.f32 %v1159_v62, %v626_v24  ;;  %v620_v32 = vmul.f32 0.2, %v607_v25  ;;  %v610_v33 = vpop.f32.mrb[6].mxu1 }
 0x39e   :  { %v611_v34 = vadd.f32 %v610_v33, %v512_v10  ;;  %v612_v36 = vpop.f32.mrb[7].mxu1  ;;  %v986_v37 = vpack.i.bf16 %v1405_v29, %v1402_v28  ;;  %v627_v42 = vmax.f32 %v605_v22, %v619_v30  ;;  %v882_v47 = vpack.c.bf16 %v1405_v29, %v1402_v28 }
 0x39f   :  { %v613_v26 = vadd.f32 %v612_v36, %v512_v10  ;;  %v991_v41 = vpack.i.bf16 %v1411_v9, %v1408_v31  ;;  %v880_v45 = vpack.c.bf16 %v1411_v9, %v1408_v31  ;;  %v628_v48 = vmax.f32 %v607_v25, %v620_v32 }
 0x3a0   :  { %v621_v43 = vmul.f32 0.2, %v611_v34  ;;  %987 = vrot.lane.b32.xlu0 %v986_v37, %s1056_s20  ;;  %v1424_v54 = vmul.f32 %v1155_v61, %v627_v42  ;;  %v1058_v31 = vmov 1966171168  }
 0x3a1   :  { %v622_v49 = vmul.f32 0.2, %v613_v26  ;;  %992 = vrot.lane.b32.xlu1 %v991_v41, %s1056_s20  ;;  %v1430_v39 = vmul.f32 %v1159_v62, %v628_v48  ;;  %v772_v9 = vunpack.c.l.s4 %v1058_v31 }
 0x3a2   :  { %v629_v50 = vmax.f32 %v611_v34, %v621_v43 }
 0x3a3   :  { %v630_v53 = vmax.f32 %v613_v26, %v622_v49 }
 0x3a4   :  { %v1427_v55 = vmul.f32 %v1155_v61, %v629_v50  ;;  %v640_v61 = vld [vmem:[%s1516_s2 + $0x60] sm:$0x1] }
 0x3a5   :  { %v1433_v40 = vmul.f32 %v1159_v62, %v630_v53 }
 0x3a6   :  { %v996_v51 = vpack.i.bf16 %v1427_v55, %v1424_v54  ;;  %v886_v56 = vpack.c.bf16 %v1427_v55, %v1424_v54 }
 0x3a7   :  { %v1006_v35 = vpack.i.bf16 %v1433_v40, %v1430_v39  ;;  %v884_v38 = vpack.c.bf16 %v1433_v40, %v1430_v39 }
 0x3a8   :  { %997 = vrot.lane.b32.xlu0 %v996_v51, %s1056_s20 }
 0x3a9   :  { %1007 = vrot.lane.b32.xlu1 %v1006_v35, %s1056_s20 }
 0x3ac   :  { %1002 = vrot.lane.b32.xlu0 %v986_v37, %s1052_s18 }
 0x3ad   :  { %1012 = vrot.lane.b32.xlu1 %v991_v41, %s1052_s18 }
 0x3b0   :  { %1017 = vrot.lane.b32.xlu0 %v996_v51, %s1052_s18 }
 0x3b1   :  { %1022 = vrot.lane.b32.xlu1 %v1006_v35, %s1052_s18 }
 0x3b4   :  { %691 = vperm.xlu0 %903, %v640_v61  }
 0x412   :  { %v988_v62 = vpop.permute.xlu0 %987 }
 0x413   :  { %v990_v52 = vunpack.i.h.bf16 %v988_v62  ;;  %v989_v59 = vunpack.i.l.bf16 %v988_v62  ;;  %v993_v63 = vpop.permute.xlu1 %992 }
 0x414   :  { %v995_v57 = vunpack.i.h.bf16 %v993_v63  ;;  %v994_v58 = vunpack.i.l.bf16 %v993_v63 }
 0x416   :  { %v661_v0 = vsel %vm460_vm5, %v994_v58, %v989_v59  ;;  %v662_v44 = vsel %vm460_vm5, %v995_v57, %v990_v52  ;;  %v657_v46 = vsel %vm460_vm5, %v989_v59, %v994_v58  ;;  %v658_v60 = vsel %vm460_vm5, %v990_v52, %v995_v57 }
 0x417   :  { %v866_v3 = vpack.c.bf16 %v662_v44, %v661_v0  ;;  %v864_v6 = vpack.c.bf16 %v658_v60, %v657_v46 }
 0x419   :  { %865 = vmatprep.subr.bf16.mxu0 %v864_v6 }
 0x41a   :  { %v998_v2 = vpop.permute.xlu0 %997  ;;  %867 = vmatpush1.bf16.msra.mxu0 %v866_v3 }
 0x41b   :  { %v1000_v5 = vunpack.i.h.bf16 %v998_v2  ;;  %v999_v7 = vunpack.i.l.bf16 %v998_v2  ;;  %v1008_v8 = vpop.permute.xlu1 %1007 }
 0x41c   :  { %v1010_v11 = vunpack.i.h.bf16 %v1008_v8  ;;  %v1009_v12 = vunpack.i.l.bf16 %v1008_v8 }
 0x41e   :  { %v663_v13 = vsel %vm460_vm5, %v1009_v12, %v999_v7  ;;  %v664_v14 = vsel %vm460_vm5, %v1010_v11, %v1000_v5  ;;  %v1003_v16 = vpop.permute.xlu0 %1002  ;;  %v659_v15 = vsel %vm460_vm5, %v999_v7, %v1009_v12  ;;  %v660_v17 = vsel %vm460_vm5, %v1000_v5, %v1010_v11 }
 0x41f   :  { %v870_v18 = vpack.c.bf16 %v664_v14, %v663_v13  ;;  %v1005_v19 = vunpack.i.h.bf16 %v1003_v16  ;;  %v1004_v20 = vunpack.i.l.bf16 %v1003_v16  ;;  %v1013_v21 = vpop.permute.xlu1 %1012  ;;  %v868_v22 = vpack.c.bf16 %v660_v17, %v659_v15 }
 0x420   :  { %v1015_v23 = vunpack.i.h.bf16 %v1013_v21  ;;  %v1014_v24 = vunpack.i.l.bf16 %v1013_v21 }
 0x421   :  { %869 = vmatprep.subr.bf16.mxu0 %v868_v22 }
 0x422   :  { %v685_v25 = vsel %vm42_vm0, %v1014_v24, %v1004_v20  ;;  %v686_v30 = vsel %vm42_vm0, %v1015_v23, %v1005_v19  ;;  %v1018_v10 = vpop.permute.xlu0 %1017  ;;  %871 = vmatpush1.bf16.msra.mxu0 %v870_v18  ;;  %v681_v32 = vsel %vm42_vm0, %v1004_v20, %v1014_v24  ;;  %v682_v33 = vsel %vm42_vm0, %v1005_v19, %v1015_v23 }
 0x423   :  { %v874_v34 = vpack.c.bf16 %v686_v30, %v685_v25  ;;  %v1020_v36 = vunpack.i.h.bf16 %v1018_v10  ;;  %v1019_v37 = vunpack.i.l.bf16 %v1018_v10  ;;  %v1023_v26 = vpop.permute.xlu1 %1022  ;;  %v872_v41 = vpack.c.bf16 %v682_v33, %v681_v32 }
 0x424   :  { %v1025_v42 = vunpack.i.h.bf16 %v1023_v26  ;;  %v1024_v43 = vunpack.i.l.bf16 %v1023_v26 }
 0x425   :  { %873 = vmatprep.subr.bf16.mxu0 %v872_v41 }
 0x426   :  { %v687_v48 = vsel %vm42_vm0, %v1024_v43, %v1019_v37  ;;  %v688_v49 = vsel %vm42_vm0, %v1025_v42, %v1020_v36  ;;  %875 = vmatpush1.bf16.msra.mxu0 %v874_v34  ;;  %v683_v50 = vsel %vm42_vm0, %v1019_v37, %v1024_v43  ;;  %v684_v53 = vsel %vm42_vm0, %v1020_v36, %v1025_v42 }
 0x427   :  { %v878_v51 = vpack.c.bf16 %v688_v49, %v687_v48  ;;  %v876_v35 = vpack.c.bf16 %v684_v53, %v683_v50 }
 0x429   :  { %877 = vmatprep.subr.bf16.mxu0 %v876_v35 }
 0x42a   :  { %879 = vmatpush1.bf16.msra.mxu0 %v878_v51 }
 0x42b   :  { %881 = vmatprep.subr.bf16.mxu0 %v880_v45  ;;  %v773_v45 = vunpack.c.0.s8 %v772_v9 }
 0x42d   :  { %v776_v39 = vsub.s32 %v773_v45, %v1084_v4 }
 0x42e   :  { %883 = vmatpush1.bf16.msra.mxu0 %v882_v47 }
 0x42f   :  { %885 = vmatprep.subr.bf16.mxu0 %v884_v38 }
 0x432   :  { %887 = vmatpush1.bf16.msra.mxu0 %v886_v56 }
 0x433   :  { %v692_v61 = vpop.permute.xlu0 %691 }
 0x435   :  { %815 = vmatmul.mubr.msk.f32.vlgmr.msra.gmra.mrb[8].mxu0 %vm310_vm4, %v639_v27 }
 0x508   :  { %v763_v28 = vpop.f32.mrb[8].mxu0 }
 0x509   :  { %v764_v29 = vadd.f32 %v763_v28, %v692_v61  ;;  %v765_v47 = vpop.f32.mrb[9].mxu0 }
 0x50a   :  { %v766_v62 = vadd.f32 %v765_v47, %v692_v61 }
 0x50c   :  { %v770_v40 = vcombine.low %v764_v29, %v766_v62 }
 0x50e   :  { %v777_v54 = vrot.slane %v770_v40, %v776_v39 }
 0x510   :  { %v784_v55 = vrot.slane %v777_v54, %v776_v39 }
 0x512   :  { %790 = vst.msk [vmem:[#allocation2] sm:$0x3] %vm788_vm7, %v784_v55 }
 0x513   :  { %1037 = shalt.err (!%p1034_p4)
}
 0x514   :  { %s1038_s17 = scalar_lea.hbm %s1517_s3, 32 }
 0x515   :  { %p1039_p5 = scmp.ne.s32.totalorder %s1517_s3, %s1038_s17  ;;  %p1042_p6 = scmp.lt.u32.totalorder %s1038_s17, %s1517_s3 }
 0x517   :  { %p1044_p7 = pnand %p1042_p6, %p1039_p5 }
 0x519   :  { %1047 = shalt.err (!%p1044_p7)
}
 0x51a   :  { %800 = dma.vmem_to_hbm [thread:$0]  %s798_s14, 32, %s1517_s3, [#allocation3]  }
 0x51b   :  { %1048 = dma.done.wait [#allocation3], 32  }
 0x51c   :  { %1049 = vsyncadd [#allocation3], 4294967264 }
 0x51d   :  { %804 = vsyncpa [#allocation3], 1 }

</bundles_post_ra>
